<compile_context>
chip_gen: v7x
topology: tpu7x:2x2x1
jax: 0.10.0
libtpu: 0.0.40
codegen_flags: <defaults>
</compile_context>

<pallas_src>
import math

import jax
import jax.numpy as jnp
from jax import lax
from jax.experimental import pallas as pl
from jax.experimental.pallas import tpu as pltpu

# ---- model dims (from the PyTorch module) ----
D_IN = 11          # node feature dim (Linear(11, 64))
D_HID = 64         # GraphConv hidden width
D_OUT = 16         # Linear(64, 16) output, split into loc(8) / scale(8)
D_ACT = 8          # action dim

# ---- graph / padding dims ----
N_NODES = 9        # ant-like skeleton: torso + 8 joints
N_PAD = 16         # node axis padded to a multiple of 8 (sublane tiling)
F_PAD = 16         # input features padded 11 -> 16

# ---- graphs per grid step (must be a multiple of 8; 8 -> M=128 rows / v5e MXU,
# ---- use 16 on v6e/v7x to fill the 256-row MXU) ----
BT = 8

# ---- packed weight-slab row layout ----
R_ENC = 0                       # [0:16)    encoder Linear(11->64), rows 11..15 zero
R_W1 = R_ENC + F_PAD            # [16:144)  GraphConv1: vstack([W_rel, W_root])
R_W2 = R_W1 + 2 * D_HID         # [144:272) GraphConv2: vstack([W_rel, W_root])
R_OUT = R_W2 + 2 * D_HID        # [272:336) output Linear(64->16), cols 16..63 zero
W_ROWS = R_OUT + D_HID          # 336 rows total
B_ROWS = 8                      # bias slab rows: enc, gc1, gc2, out, rest zero

_SOFTPLUS_BIAS = math.log(math.e - 1.0)   # inverse_softplus(1.0)  (biased_softplus_1.0)
_SCALE_LB = 1e-4


def _softplus(x):
    # numerically stable softplus (VPU + EUP ops only)
    return jnp.maximum(x, 0.0) + jnp.log1p(jnp.exp(-jnp.abs(x)))


# ---------------------------------------------------------------------------
# Kernel: BT graphs per grid step; weights / adjacency resident in VMEM.
# ---------------------------------------------------------------------------
def multinode_actor_kernel(x_ref, g_ref, w_ref, b_ref, out_ref):
    m = x_ref.shape[0]            # BT * N_PAD (static)
    bt = out_ref.shape[0]         # BT (static)

    x = x_ref[...]                               # [M, 16]  node features (padded)

    a_bd = g_ref[0:m, :]                         # [M, M]   block-diagonal A[dst, src]
    poolw = g_ref[m:m + bt, :]                   # [BT, M]  masked mean-pool weights

    w_enc = w_ref[R_ENC:R_ENC + F_PAD, :]        # [16, 64]
    w1_rel = w_ref[R_W1:R_W1 + D_HID, :]         # [64, 64]
    w1_root = w_ref[R_W1 + D_HID:R_W1 + 2 * D_HID, :]
    w2_rel = w_ref[R_W2:R_W2 + D_HID, :]
    w2_root = w_ref[R_W2 + D_HID:R_W2 + 2 * D_HID, :]
    w_out = w_ref[R_OUT:R_OUT + D_HID, :]        # [64, 64]  (cols 16..63 zero)

    b_enc = b_ref[0:1, :]                        # [1, 64]
    b1 = b_ref[1:2, :]
    b2 = b_ref[2:3, :]
    b_out = b_ref[3:4, :]                        # cols 16..63 zero

    # --- encoder Linear(11 -> 64) (no activation, as in the module) -------
    h0 = jnp.dot(x, w_enc, preferred_element_type=jnp.float32) + b_enc       # [M, 64]

    # --- GraphConv 1 + tanh (unfused: two K=64 matmuls, no lane concat) ----
    agg1 = jnp.dot(a_bd, h0, preferred_element_type=jnp.float32)             # [M, 64]
    h1 = jnp.tanh(jnp.dot(agg1, w1_rel, preferred_element_type=jnp.float32)
                  + jnp.dot(h0, w1_root, preferred_element_type=jnp.float32)
                  + b1)                                                       # [M, 64]

    # --- GraphConv 2 + tanh ------------------------------------------------
    agg2 = jnp.dot(a_bd, h1, preferred_element_type=jnp.float32)
    h2 = jnp.tanh(jnp.dot(agg2, w2_rel, preferred_element_type=jnp.float32)
                  + jnp.dot(h1, w2_root, preferred_element_type=jnp.float32)
                  + b2)                                                       # [M, 64]

    # --- output Linear(64 -> 16) + tanh (padded to 64 lanes) ---------------
    h3 = jnp.tanh(jnp.dot(h2, w_out, preferred_element_type=jnp.float32) + b_out)

    # --- global_mean_pool over the 9 real nodes of each graph --------------
    pooled = jnp.dot(poolw, h3, preferred_element_type=jnp.float32)          # [BT, 64]

    # --- NormalParamExtractor: lanes 0..7 = loc, lanes 8..15 = scale -------
    lane = lax.broadcasted_iota(jnp.int32, pooled.shape, 1)
    sp = jnp.maximum(_softplus(pooled + _SOFTPLUS_BIAS), _SCALE_LB)
    out_ref[...] = jnp.where(lane >= D_ACT, sp, pooled)                      # [BT, 64]


# ---------------------------------------------------------------------------
# Wrappers
# ---------------------------------------------------------------------------
def multinode_actor_forward(x_nodes, g_slab, w_slab, b_slab, *, bt=BT):
    """Batched (list-of-Data) branch: x_nodes [B, 9, 11] -> loc/scale of shape [B, 8]."""
    assert bt % 8 == 0, "BT must be a multiple of 8 (sublane tiling)"
    B = x_nodes.shape[0]
    ntiles = -(-B // bt)
    b_padded = ntiles * bt
    m = bt * N_PAD

    # pad / flatten node features to [B_pad*16, 16] so the kernel sees M=BT*16 rows
    x_pad = jnp.zeros((b_padded, N_PAD, F_PAD), jnp.float32)
    x_pad = x_pad.at[:B, :N_NODES, :D_IN].set(x_nodes.astype(jnp.float32))
    x_flat = x_pad.reshape(b_padded * N_PAD, F_PAD)

    flops_tile = 2 * (m * F_PAD * D_HID          # encoder
                      + 2 * m * m * D_HID        # agg1 + agg2
                      + 4 * m * D_HID * D_HID    # GraphConv rel + root (x2 layers)
                      + m * D_HID * D_HID        # output linear
                      + bt * m * D_HID)          # pooling
    trans_tile = 3 * m * D_HID + bt * D_HID
    bytes_acc = 4 * (ntiles * (m * F_PAD + bt * D_HID)
                     + W_ROWS * D_HID + B_ROWS * D_HID + (m + bt) * m)
    cost = pl.CostEstimate(flops=flops_tile * ntiles,
                           transcendentals=trans_tile * ntiles,
                           bytes_accessed=bytes_acc)

    out = pl.pallas_call(
        multinode_actor_kernel,
        out_shape=jax.ShapeDtypeStruct((b_padded, D_HID), jnp.float32),
        grid_spec=pltpu.PrefetchScalarGridSpec(
            num_scalar_prefetch=0,
            grid=(ntiles,),
            in_specs=[
                pl.BlockSpec((m, F_PAD), lambda b: (b, 0)),          # per-tile node features
                pl.BlockSpec((m + bt, m), lambda b: (0, 0)),         # block-diag A + pool (loaded once)
                pl.BlockSpec((W_ROWS, D_HID), lambda b: (0, 0)),     # all weights (loaded once)
                pl.BlockSpec((B_ROWS, D_HID), lambda b: (0, 0)),     # all biases (loaded once)
            ],
            out_specs=pl.BlockSpec((bt, D_HID), lambda b: (b, 0)),   # [BT, 64] block per step
        ),
        compiler_params=pltpu.CompilerParams(dimension_semantics=("parallel",)),
        cost_estimate=cost,
    )(x_flat, g_slab, w_slab, b_slab)

    loc = out[:B, :D_ACT]
    scale = out[:B, D_ACT:D_OUT]
    return loc, scale


def multinode_actor_forward_single(x_nodes_single, g_slab, w_slab, b_slab, *, bt=BT):
    """Single-Data branch: loc/scale of shape [8] (loc.t().squeeze(-1) in the module)."""
    loc, scale = multinode_actor_forward(x_nodes_single[None], g_slab, w_slab, b_slab, bt=bt)
    return loc[0], scale[0]


# ---------------------------------------------------------------------------
# Host-side packing (slab construction)
# ---------------------------------------------------------------------------
def pack_params(params):
    w_enc_pad = jnp.zeros((F_PAD, D_HID), jnp.float32).at[:D_IN, :].set(params["w_enc"])
    w1_cat = jnp.concatenate([params["w1_rel"], params["w1_root"]], axis=0)   # [128, 64]
    w2_cat = jnp.concatenate([params["w2_rel"], params["w2_root"]], axis=0)   # [128, 64]
    w_out_pad = jnp.zeros((D_HID, D_HID), jnp.float32).at[:, :D_OUT].set(params["w_out"])
    w_slab = jnp.concatenate([w_enc_pad, w1_cat, w2_cat, w_out_pad], axis=0)  # [336, 64]

    b_slab = jnp.zeros((B_ROWS, D_HID), jnp.float32)
    b_slab = b_slab.at[0, :].set(params["b_enc"])
    b_slab = b_slab.at[1, :].set(params["b1_rel"])
    b_slab = b_slab.at[2, :].set(params["b2_rel"])
    b_slab = b_slab.at[3, :D_OUT].set(params["b_out"])
    return w_slab, b_slab


def pack_graph(A, *, bt=BT):
    """Static block-diagonal adjacency + mean-pool matrix for BT identical skeletons."""
    a16 = jnp.zeros((N_PAD, N_PAD), jnp.float32).at[:N_NODES, :N_NODES].set(A)
    a_bd = jnp.kron(jnp.eye(bt, dtype=jnp.float32), a16)                      # [BT*16, BT*16]
    pool_row = jnp.zeros((1, N_PAD), jnp.float32).at[0, :N_NODES].set(1.0 / N_NODES)
    poolw = jnp.kron(jnp.eye(bt, dtype=jnp.float32), pool_row)                # [BT, BT*16]
    return jnp.concatenate([a_bd, poolw], axis=0)                             # [BT*17, BT*16]


# ---------------------------------------------------------------------------
# Pure-JAX reference (unpacked weights, unfused matmuls) for correctness
# ---------------------------------------------------------------------------
def multinode_actor_reference(x, A, p):
    h0 = x @ p["w_enc"] + p["b_enc"]
    h1 = jnp.tanh((A @ h0) @ p["w1_rel"] + p["b1_rel"] + h0 @ p["w1_root"])
    h2 = jnp.tanh((A @ h1) @ p["w2_rel"] + p["b2_rel"] + h1 @ p["w2_root"])
    h3 = jnp.tanh(h2 @ p["w_out"] + p["b_out"])
    pooled = jnp.mean(h3, axis=0)                     # global_mean_pool (single graph)
    loc = pooled[:D_ACT]
    scale = jnp.maximum(jax.nn.softplus(pooled[D_ACT:] + _SOFTPLUS_BIAS), _SCALE_LB)
    return loc, scale


# ---------------------------------------------------------------------------
# Deterministic example graph / params
# ---------------------------------------------------------------------------
def build_adjacency():
    # ant-like skeleton: torso (node 0) <-> hip joints {1,3,5,7},
    # knee edges (1,2),(3,4),(5,6),(7,8), all bidirectional
    src, dst = [], []
    for h in (1, 3, 5, 7):
        src += [0, h]; dst += [h, 0]
    for a, b in ((1, 2), (3, 4), (5, 6), (7, 8)):
        src += [a, b]; dst += [b, a]
    A = jnp.zeros((N_NODES, N_NODES), jnp.float32)
    return A.at[jnp.array(dst), jnp.array(src)].add(1.0)


def init_params(key):
    keys = iter(jax.random.split(key, 16))

    def nrm(shape):
        return (0.1 * jax.random.normal(next(keys), shape)).astype(jnp.float32)

    p = {}
    p["w_enc"], p["b_enc"] = nrm((D_IN, D_HID)), nrm((D_HID,))
    p["w1_rel"], p["b1_rel"], p["w1_root"] = nrm((D_HID, D_HID)), nrm((D_HID,)), nrm((D_HID, D_HID))
    p["w2_rel"], p["b2_rel"], p["w2_root"] = nrm((D_HID, D_HID)), nrm((D_HID,)), nrm((D_HID, D_HID))
    p["w_out"], p["b_out"] = nrm((D_HID, D_OUT)), nrm((D_OUT,))
    return p


if __name__ == "__main__":
    key = jax.random.PRNGKey(0)
    kx, kp = jax.random.split(key)

    B = 16                        # -> grid = 2 tiles of BT=8 graphs (even, >=2 for v7x)
    x_nodes = jax.random.normal(kx, (B, N_NODES, D_IN), dtype=jnp.float32)
    params = init_params(kp)
    A = build_adjacency()

    w_slab, b_slab = pack_params(params)
    g_slab = pack_graph(A, bt=BT)

    # batched (list-of-Data) branch
    loc, scale = multinode_actor_forward(x_nodes, g_slab, w_slab, b_slab, bt=BT)
    jax.block_until_ready((loc, scale))
    assert loc.shape == (B, D_ACT) and scale.shape == (B, D_ACT)

    loc_ref = jnp.stack([multinode_actor_reference(x_nodes[b], A, params)[0] for b in range(B)])
    scale_ref = jnp.stack([multinode_actor_reference(x_nodes[b], A, params)[1] for b in range(B)])
    assert jnp.allclose(loc, loc_ref, atol=1e-4, rtol=1e-4)
    assert jnp.allclose(scale, scale_ref, atol=1e-4, rtol=1e-4)
    assert bool(jnp.all(scale > 0.0))

    # single-Data branch (loc.t().squeeze(-1)) -> shape [8]
    loc1, scale1 = multinode_actor_forward_single(x_nodes[0], g_slab, w_slab, b_slab, bt=BT)
    jax.block_until_ready((loc1, scale1))
    assert loc1.shape == (D_ACT,) and scale1.shape == (D_ACT,)
    assert jnp.allclose(loc1, loc[0], atol=1e-5)
    assert jnp.allclose(scale1, scale[0], atol=1e-5)

    print("KERNEL_OK")
</pallas_src>

<mosaic_0001>
module attributes {stable_mosaic.version = 11 : i64} {
  func.func @multinode_actor_kernel(%arg0: i32, %arg1: memref<128x16xf32, #tpu.memory_space<vmem>>, %arg2: memref<136x128xf32, #tpu.memory_space<vmem>>, %arg3: memref<336x64xf32, #tpu.memory_space<vmem>>, %arg4: memref<8x64xf32, #tpu.memory_space<vmem>>, %arg5: memref<8x64xf32, #tpu.memory_space<vmem>>) attributes {dimension_semantics = [#tpu.dimension_semantics<parallel>], iteration_bounds = array<i64: 2>, scalar_prefetch = 0 : i64, scratch_operands = 0 : i64, tpu.core_type = #tpu.core_type<tc>, window_params = [{transform_indices = @transform_0, window_bounds = array<i64: 128, 16>}, {pipeline_mode = #tpu.pipeline_mode<synchronous>, transform_indices = @transform_1, window_bounds = array<i64: 136, 128>}, {pipeline_mode = #tpu.pipeline_mode<synchronous>, transform_indices = @transform_2, window_bounds = array<i64: 336, 64>}, {pipeline_mode = #tpu.pipeline_mode<synchronous>, transform_indices = @transform_3, window_bounds = array<i64: 8, 64>}, {transform_indices = @transform_4, window_bounds = array<i64: 8, 64>}]} {
    %c0 = arith.constant 0 : index
    %c0_0 = arith.constant 0 : index
    %0 = vector.load %arg1[%c0, %c0_0] : memref<128x16xf32, #tpu.memory_space<vmem>>, vector<128x16xf32>
    %c0_1 = arith.constant 0 : index
    %c0_2 = arith.constant 0 : index
    %1 = vector.load %arg2[%c0_1, %c0_2] : memref<136x128xf32, #tpu.memory_space<vmem>>, vector<128x128xf32>
    %c128 = arith.constant 128 : index
    %c0_3 = arith.constant 0 : index
    %2 = vector.load %arg2[%c128, %c0_3] : memref<136x128xf32, #tpu.memory_space<vmem>>, vector<8x128xf32>
    %c0_4 = arith.constant 0 : index
    %c0_5 = arith.constant 0 : index
    %3 = vector.load %arg3[%c0_4, %c0_5] : memref<336x64xf32, #tpu.memory_space<vmem>>, vector<16x64xf32>
    %c16 = arith.constant 16 : index
    %c0_6 = arith.constant 0 : index
    %4 = vector.load %arg3[%c16, %c0_6] : memref<336x64xf32, #tpu.memory_space<vmem>>, vector<64x64xf32>
    %c80 = arith.constant 80 : index
    %c0_7 = arith.constant 0 : index
    %5 = vector.load %arg3[%c80, %c0_7] : memref<336x64xf32, #tpu.memory_space<vmem>>, vector<64x64xf32>
    %c144 = arith.constant 144 : index
    %c0_8 = arith.constant 0 : index
    %6 = vector.load %arg3[%c144, %c0_8] : memref<336x64xf32, #tpu.memory_space<vmem>>, vector<64x64xf32>
    %c208 = arith.constant 208 : index
    %c0_9 = arith.constant 0 : index
    %7 = vector.load %arg3[%c208, %c0_9] : memref<336x64xf32, #tpu.memory_space<vmem>>, vector<64x64xf32>
    %c272 = arith.constant 272 : index
    %c0_10 = arith.constant 0 : index
    %8 = vector.load %arg3[%c272, %c0_10] : memref<336x64xf32, #tpu.memory_space<vmem>>, vector<64x64xf32>
    %c0_11 = arith.constant 0 : index
    %c0_12 = arith.constant 0 : index
    %9 = vector.load %arg4[%c0_11, %c0_12] : memref<8x64xf32, #tpu.memory_space<vmem>>, vector<1x64xf32>
    %c1 = arith.constant 1 : index
    %c0_13 = arith.constant 0 : index
    %10 = vector.load %arg4[%c1, %c0_13] : memref<8x64xf32, #tpu.memory_space<vmem>>, vector<1x64xf32>
    %c2 = arith.constant 2 : index
    %c0_14 = arith.constant 0 : index
    %11 = vector.load %arg4[%c2, %c0_14] : memref<8x64xf32, #tpu.memory_space<vmem>>, vector<1x64xf32>
    %c3 = arith.constant 3 : index
    %c0_15 = arith.constant 0 : index
    %12 = vector.load %arg4[%c3, %c0_15] : memref<8x64xf32, #tpu.memory_space<vmem>>, vector<1x64xf32>
    %cst = arith.constant dense<0.000000e+00> : vector<128x64xf32>
    %13 = tpu.matmul %0, %3, %cst {dimension_numbers = #tpu.dot_dimension_numbers<[1], [0], [0], [1], [0, 0, 1, 1], [], []>} : vector<128x16xf32>, vector<16x64xf32>, vector<128x64xf32> -> vector<128x64xf32>
    %14 = vector.broadcast %9 : vector<1x64xf32> to vector<128x64xf32>
    %15 = arith.addf %13, %14 : vector<128x64xf32>
    %cst_16 = arith.constant dense<0.000000e+00> : vector<128x64xf32>
    %16 = tpu.matmul %1, %15, %cst_16 {dimension_numbers = #tpu.dot_dimension_numbers<[1], [0], [0], [1], [0, 0, 1, 1], [], []>} : vector<128x128xf32>, vector<128x64xf32>, vector<128x64xf32> -> vector<128x64xf32>
    %cst_17 = arith.constant dense<0.000000e+00> : vector<128x64xf32>
    %17 = tpu.matmul %16, %4, %cst_17 {dimension_numbers = #tpu.dot_dimension_numbers<[1], [0], [0], [1], [0, 0, 1, 1], [], []>} : vector<128x64xf32>, vector<64x64xf32>, vector<128x64xf32> -> vector<128x64xf32>
    %cst_18 = arith.constant dense<0.000000e+00> : vector<128x64xf32>
    %18 = tpu.matmul %15, %5, %cst_18 {dimension_numbers = #tpu.dot_dimension_numbers<[1], [0], [0], [1], [0, 0, 1, 1], [], []>} : vector<128x64xf32>, vector<64x64xf32>, vector<128x64xf32> -> vector<128x64xf32>
    %19 = arith.addf %17, %18 : vector<128x64xf32>
    %20 = vector.broadcast %10 : vector<1x64xf32> to vector<128x64xf32>
    %21 = arith.addf %19, %20 : vector<128x64xf32>
    %22 = math.tanh %21 : vector<128x64xf32>
    %cst_19 = arith.constant dense<0.000000e+00> : vector<128x64xf32>
    %23 = tpu.matmul %1, %22, %cst_19 {dimension_numbers = #tpu.dot_dimension_numbers<[1], [0], [0], [1], [0, 0, 1, 1], [], []>} : vector<128x128xf32>, vector<128x64xf32>, vector<128x64xf32> -> vector<128x64xf32>
    %cst_20 = arith.constant dense<0.000000e+00> : vector<128x64xf32>
    %24 = tpu.matmul %23, %6, %cst_20 {dimension_numbers = #tpu.dot_dimension_numbers<[1], [0], [0], [1], [0, 0, 1, 1], [], []>} : vector<128x64xf32>, vector<64x64xf32>, vector<128x64xf32> -> vector<128x64xf32>
    %cst_21 = arith.constant dense<0.000000e+00> : vector<128x64xf32>
    %25 = tpu.matmul %22, %7, %cst_21 {dimension_numbers = #tpu.dot_dimension_numbers<[1], [0], [0], [1], [0, 0, 1, 1], [], []>} : vector<128x64xf32>, vector<64x64xf32>, vector<128x64xf32> -> vector<128x64xf32>
    %26 = arith.addf %24, %25 : vector<128x64xf32>
    %27 = vector.broadcast %11 : vector<1x64xf32> to vector<128x64xf32>
    %28 = arith.addf %26, %27 : vector<128x64xf32>
    %29 = math.tanh %28 : vector<128x64xf32>
    %cst_22 = arith.constant dense<0.000000e+00> : vector<128x64xf32>
    %30 = tpu.matmul %29, %8, %cst_22 {dimension_numbers = #tpu.dot_dimension_numbers<[1], [0], [0], [1], [0, 0, 1, 1], [], []>} : vector<128x64xf32>, vector<64x64xf32>, vector<128x64xf32> -> vector<128x64xf32>
    %31 = vector.broadcast %12 : vector<1x64xf32> to vector<128x64xf32>
    %32 = arith.addf %30, %31 : vector<128x64xf32>
    %33 = math.tanh %32 : vector<128x64xf32>
    %cst_23 = arith.constant dense<0.000000e+00> : vector<8x64xf32>
    %34 = tpu.matmul %2, %33, %cst_23 {dimension_numbers = #tpu.dot_dimension_numbers<[1], [0], [0], [1], [0, 0, 1, 1], [], []>} : vector<8x128xf32>, vector<128x64xf32>, vector<8x64xf32> -> vector<8x64xf32>
    %35 = tpu.iota {dimensions = array<i32: 1>} : vector<8x64xi32>
    %cst_24 = arith.constant 0.541324854 : f32
    %36 = vector.broadcast %cst_24 : f32 to vector<8x64xf32>
    %37 = arith.addf %34, %36 : vector<8x64xf32>
    %cst_25 = arith.constant 0.000000e+00 : f32
    %38 = vector.broadcast %cst_25 : f32 to vector<8x64xf32>
    %39 = arith.maximumf %37, %38 : vector<8x64xf32>
    %40 = math.absf %37 : vector<8x64xf32>
    %cst_26 = arith.constant 0.000000e+00 : f32
    %41 = vector.broadcast %cst_26 : f32 to vector<8x64xf32>
    %42 = arith.subf %41, %40 : vector<8x64xf32>
    %43 = math.exp %42 : vector<8x64xf32>
    %44 = math.log1p %43 : vector<8x64xf32>
    %45 = arith.addf %39, %44 : vector<8x64xf32>
    %cst_27 = arith.constant 9.99999974E-5 : f32
    %46 = vector.broadcast %cst_27 : f32 to vector<8x64xf32>
    %47 = arith.maximumf %45, %46 : vector<8x64xf32>
    %c8_i32 = arith.constant 8 : i32
    %48 = vector.broadcast %c8_i32 : i32 to vector<8x64xi32>
    %49 = arith.cmpi sge, %35, %48 : vector<8x64xi32>
    %50 = arith.select %49, %47, %34 : vector<8x64xi1>, vector<8x64xf32>
    %c0_28 = arith.constant 0 : index
    %c0_29 = arith.constant 0 : index
    %51 = vector.load %arg5[%c0_28, %c0_29] : memref<8x64xf32, #tpu.memory_space<vmem>>, vector<8x64xf32>
    tpu.vector_store %arg5[%c0_28, %c0_29], %50 {strides = array<i32>} : memref<8x64xf32, #tpu.memory_space<vmem>>, vector<8x64xf32>,
    return
  }
  func.func @transform_0(%arg0: i32) -> (i32, i32) {
    %c0_i32 = arith.constant 0 : i32
    %c0_i32_0 = arith.constant 0 : i32
    return %arg0, %c0_i32 : i32, i32
  }
  func.func @transform_1(%arg0: i32) -> (i32, i32) {
    %c0_i32 = arith.constant 0 : i32
    %c0_i32_0 = arith.constant 0 : i32
    %c0_i32_1 = arith.constant 0 : i32
    return %c0_i32, %c0_i32_0 : i32, i32
  }
  func.func @transform_2(%arg0: i32) -> (i32, i32) {
    %c0_i32 = arith.constant 0 : i32
    %c0_i32_0 = arith.constant 0 : i32
    %c0_i32_1 = arith.constant 0 : i32
    return %c0_i32, %c0_i32_0 : i32, i32
  }
  func.func @transform_3(%arg0: i32) -> (i32, i32) {
    %c0_i32 = arith.constant 0 : i32
    %c0_i32_0 = arith.constant 0 : i32
    %c0_i32_1 = arith.constant 0 : i32
    return %c0_i32, %c0_i32_0 : i32, i32
  }
  func.func @transform_4(%arg0: i32) -> (i32, i32) {
    %c0_i32 = arith.constant 0 : i32
    %c0_i32_0 = arith.constant 0 : i32
    return %arg0, %c0_i32 : i32, i32
  }
}

</mosaic_0001>

<bundles_post_ra>
// kernel: tpu_custom_call.1
= control target key start
LH: loop header
LB: loop body
LE: loop exit
PB: predicated region body
PF: predicated region fallthrough
CT: control target
= control target key end

     0   :  { %9 = vsyncpa [#allocation3], 0  ;;  %s3755_s0 = inlined_call_operand.vmem [shape: f32[256,16], index: 0, kind: input, shape index: {}]   ;;  %s3756_s1 = inlined_call_operand.vmem [shape: f32[136,128], index: 1, kind: input, shape index: {}]   ;;  %s3757_s2 = inlined_call_operand.vmem [shape: f32[336,64], index: 2, kind: input, shape index: {}]   ;;  %s3758_s3 = inlined_call_operand.vmem [shape: f32[8,64], index: 3, kind: input, shape index: {}]   ;;  %s3759_s4 = inlined_call_operand.hbm [shape: f32[16,64], index: 4, kind: output, shape index: {}]  }
   0x1   :  { %11 = vsyncpa [#allocation3 + $0x1], 0  ;;  %s3148_s15 = smov 0   ;;  %s3150_s16 = smov 0  }
   0x2   :  { %s3152_s17 = smov 0   ;;  %s3154_s18 = smov 0  }
   0x3 LB: > { %s3169_s19 = sadd.s32 4294967295, %s3117_s18   ;;  %s1988_s20 = sadd.s32 4294967294, %s3117_s18   ;;  %s3117_s18 = sphi %s3154_s18, %s3765_s18   ;;  %s3113_s17 = sphi %s3152_s17, %s3764_s17   ;;  %s3109_s16 = sphi %s3150_s16, %s3763_s16   ;;  %s3105_s15 = sphi %s3148_s15, %s3762_s15  }
   0x4   : > { %s3173_s21 = sadd.s32 1, %s3117_s18   ;;  %s113_s22 = sadd.s32 1, %s3113_s17 }
   0x5   : > { %s110_s23 = ssub.s32 %s3117_s18, %s3173_s21  ;;  %p123_p0 = scmp.ne.s32.totalorder %s3113_s17, %s3109_s16 }
   0x6   : > { %p111_p1 = scmp.eq.s32.totalorder %s110_s23, 0  ;;  %p124_p2 = scmp.eq.s32.totalorder %s3169_s19, 1 }
   0x7   : > { %p129_p3 = scmp.ne.s32.totalorder %s3109_s16, %s3105_s15  ;;  %p130_p4 = scmp.eq.s32.totalorder %s1988_s20, 1 }
   0x8   : > { %s3184_s24 = scalar_select %p111_p1, %s3113_s17, %s113_s22  }
   0x9   : > { %p3186_p5 = por %p124_p2, %p123_p0  ;;  %p3190_p6 = por %p130_p4, %p129_p3 }
   0xa   : > { %p1991_p7 = scmp.ge.s32.totalorder %s3117_s18, 1  ;;  %p166_p8 = scmp.lt.s32.totalorder %s3117_s18, 3 }
   0xc   : > { %p167_p9 = pnand %p1991_p7, %p166_p8 }
   0xd   : > { %v231_v0 = vld [vmem:[%s3757_s2] sm:$0xff] (!%p167_p9)  ;;  %v232_v1 = vld [vmem:[%s3757_s2 + $0x8] sm:$0xff] (!%p167_p9)  ;;  %s1993_s5 = sshll.u32 (!%p167_p9), %s3169_s19, 4  ;;  %v241_v2 = vld [vmem:[%s3757_s2 + $0x50] sm:$0xff] (!%p167_p9)  ;;  %vm281_vm0 = vcmask (!%p167_p9), 130048   ;;  %vm620_vm1 = vcmask (!%p167_p9), 523264  }
   0xe   : > { %170 = sbr.rel (%p167_p9) target bundleno = 1715 (0x6b3), region = 36  ;;  %v2693_v3 = vpack.c.bf16 (!%p167_p9), %v232_v1, %v231_v0  ;;  %p193_p10 = scmp.lt.s32.totalorder (!%p167_p9), %s1993_s5, 31  ;;  %v242_v4 = vld [vmem:[%s3757_s2 + $0x58] sm:$0xff] (!%p167_p9)  ;;  %v243_v5 = vld [vmem:[%s3757_s2 + $0x60] sm:$0xff] (!%p167_p9)  ;;  %v244_v6 = vld [vmem:[%s3757_s2 + $0x68] sm:$0xff] (!%p167_p9)  ;;  %vm3120_vm2 = vmmov (!%p167_p9), 0  }
   0xf   : > { %v2729_v7 = vpack.c.bf16 (!%p167_p9), %v242_v4, %v241_v2  ;;  %v2733_v8 = vpack.c.bf16 (!%p167_p9), %v244_v6, %v243_v5  ;;  %v245_v9 = vld [vmem:[%s3757_s2 + $0x70] sm:$0xff] (!%p167_p9)  ;;  %v246_v10 = vld [vmem:[%s3757_s2 + $0x78] sm:$0xff] (!%p167_p9)  ;;  %v247_v28 = vld [vmem:[%s3757_s2 + $0x80] sm:$0xff] (!%p167_p9)  ;;  %s189_s13 = sand.u32 (!%p167_p9), 1, %s3109_s16   ;;  %s2096_s20 = sshll.u32 (!%p167_p9), %s3169_s19, 7 }
  0x10   : > { %2694 = vmatprep.subr.bf16.mxu1 (!%p167_p9), %v2693_v3  ;;  %v2737_v11 = vpack.c.bf16 (!%p167_p9), %v246_v10, %v245_v9  ;;  %v248_v29 = vld [vmem:[%s3757_s2 + $0x88] sm:$0xff] (!%p167_p9)  ;;  %v3267_v31 = vld [vmem:[%s3756_s1] sm:$0xff] (!%p167_p9)  ;;  %v233_v32 = vld [vmem:[%s3757_s2 + $0x10] sm:$0xff] (!%p167_p9)  ;;  %s1992_s14 = sshll.u32 (!%p167_p9), %s189_s13, 3  ;;  %s3712_s29 = scalar_lea.hbm (!%p167_p9), %s3759_s4, %s2096_s20 }
  0x11   : > { %2696 = vmatpush3.bf16.msra.mxu1 (!%p167_p9), %v2693_v3  ;;  %2730 = vmatprep.subr.bf16.mxu0 (!%p167_p9), %v2729_v7  ;;  %v2741_v30 = vpack.c.bf16 (!%p167_p9), %v248_v29, %v247_v28  ;;  %v234_v33 = vld [vmem:[%s3757_s2 + $0x18] sm:$0xff] (!%p167_p9)  ;;  %v3279_v35 = vld [vmem:[%s3758_s3] ss:$0 sm:$0xff] (!%p167_p9)  ;;  %v236_v38 = vld [vmem:[%s3757_s2 + $0x28] sm:$0xff] (!%p167_p9)  ;;  %s191_s22 = scalar_lea.vmem (!%p167_p9), [#allocation2], %s1992_s14  ;;  %s3122_s19 = smov (!%p167_p9), [#allocation2]  }
  0x12   : > { %2732 = vmatpush3.bf16.msra.mxu0 (!%p167_p9), %v2729_v7  ;;  %v2745_v34 = vpack.c.bf16 (!%p167_p9), %v234_v33, %v233_v32  ;;  %v235_v37 = vld [vmem:[%s3757_s2 + $0x20] sm:$0xff] (!%p167_p9)  ;;  %v237_v45 = vld [vmem:[%s3757_s2 + $0x30] sm:$0xff] (!%p167_p9)  ;;  %v238_v46 = vld [vmem:[%s3757_s2 + $0x38] sm:$0xff] (!%p167_p9)  ;;  %s1929_s23 = sshll.u32 (!%p167_p9), %s191_s22, 4  ;;  %s3059_s6 = sshll.u32 (!%p167_p9), %s3122_s19, 4  ;;  %s3714_s23 = int_to_ptr.vmem [resolvable:$true] %s1929_s23  ;;  %s3060_s6 = int_to_ptr.vmem [resolvable:$false] %s3059_s6 }
  0x13   : > { %2734 = vmatprep.subr.bf16.mxu0 (!%p167_p9), %v2733_v8  ;;  %v2749_v42 = vpack.c.bf16 (!%p167_p9), %v236_v38, %v235_v37  ;;  %v2753_v50 = vpack.c.bf16 (!%p167_p9), %v238_v46, %v237_v45  ;;  %v239_v53 = vld [vmem:[%s3757_s2 + $0x40] sm:$0xff] (!%p167_p9)  ;;  %v240_v54 = vld [vmem:[%s3757_s2 + $0x48] sm:$0xff] (!%p167_p9)  ;;  %v3391_v32 = vld [vmem:[%s3756_s1 + $0x58] sm:$0xff] (!%p167_p9)  ;;  %s3061_s7 = scalar_lea.vmem (!%p167_p9), %s3060_s6, 256  ;;  %p3062_p0 = scmp.lt.s32.totalorder (!%p167_p9), %s3714_s23, %s3060_s6 }
  0x14   : > { %v2757_v58 = vpack.c.bf16 (!%p167_p9), %v240_v54, %v239_v53  ;;  %v222_v28 = vld [vmem:[%s3756_s1 + $0x40] sm:$0xff] (!%p167_p9)  ;;  %v3379_v29 = vld [vmem:[%s3756_s1 + $0x48] sm:$0xff] (!%p167_p9) }
  0x15   : > { %s3767_s5 = smov (!%p193_p10, %s1993_s5), 31  ;;  %v3396_v33 = vld [vmem:[%s3756_s1 + $0x60] sm:$0xff] }
  0x16   : > { %s1994_s27 = sshll.u32 %s3767_s5, 3  ;;  %2736 = vmatpush3.bf16.msra.mxu0 %v2733_v8  ;;  %v3438_v53 = vld [vmem:[%s3758_s3 + $0x1] ss:$0 sm:$0xff]  ;;  %s3055_s5 = scalar_lea.vmem %s3714_s23, 128 }
  0x17   : > { %s3224_s30 = scalar_lea.vmem %s3755_s0, %s1994_s27  ;;  %2738 = vmatprep.subr.bf16.mxu0 %v2737_v11  ;;  %p3056_p11 = scmp.ne.s32.totalorder %s3714_s23, %s3055_s5 }
  0x18   : > { %v198_v12 = vld [vmem:[%s3224_s30] sm:$0xff]  ;;  %v199_v13 = vld [vmem:[%s3224_s30 + $0x8] sm:$0xff]  ;;  %v200_v14 = vld [vmem:[%s3224_s30 + $0x10] sm:$0xff]  ;;  %p3063_p1 = scmp.lt.s32.totalorder %s3061_s7, %s3055_s5 }
  0x19   : > { %2322 = vmatprep.mubr.msk.f32.mxu1 %vm281_vm0, %v198_v12  ;;  %v201_v15 = vld [vmem:[%s3224_s30 + $0x18] sm:$0xff]  ;;  %v202_v16 = vld [vmem:[%s3224_s30 + $0x20] sm:$0xff]  ;;  %v203_v17 = vld [vmem:[%s3224_s30 + $0x28] sm:$0xff]  ;;  %p3057_p12 = pnand %p3056_p11, %p3186_p5 }
  0x1a   : > { %2323 = vmatmul.mubr.msk.f32.vlgmr.msra.gmra.mrb[0].mxu1 %vm281_vm0, %v199_v13  ;;  %2740 = vmatpush3.bf16.msra.mxu0 %v2737_v11  ;;  %v204_v18 = vld [vmem:[%s3224_s30 + $0x30] sm:$0xff]  ;;  %v205_v19 = vld [vmem:[%s3224_s30 + $0x38] sm:$0xff]  ;;  %v206_v20 = vld [vmem:[%s3224_s30 + $0x40] sm:$0xff]  ;;  %p3064_p2 = por %p3063_p1, %p3062_p0 }
  0x1b   : > { %2325 = vmatprep.mubr.msk.f32.mxu1 %vm281_vm0, %v200_v14  ;;  %v207_v21 = vld [vmem:[%s3224_s30 + $0x48] sm:$0xff]  ;;  %v208_v22 = vld [vmem:[%s3224_s30 + $0x50] sm:$0xff]  ;;  %v209_v23 = vld [vmem:[%s3224_s30 + $0x58] sm:$0xff]  ;;  %2742 = vmatprep.subr.bf16.mxu0 %v2741_v30  ;;  %p3058_p13 = pneg %p3057_p12 }
  0x1c   : > { %v210_v24 = vld [vmem:[%s3224_s30 + $0x60] sm:$0xff]  ;;  %v211_v25 = vld [vmem:[%s3224_s30 + $0x68] sm:$0xff]  ;;  %v212_v26 = vld [vmem:[%s3224_s30 + $0x70] sm:$0xff] }
  0x1d   : > { %v213_v27 = vld [vmem:[%s3224_s30 + $0x78] sm:$0xff]  ;;  %s1916_s30 = scalar_lea.sflag [#allocation3], %s189_s13  ;;  %p3065_p3 = pnand %p3064_p2, %p3058_p13 }
  0x1e   : > { %2326 = vmatmul.mubr.msk.f32.gmra.mrb[2].mxu1 %vm281_vm0, %v201_v15  ;;  %2744 = vmatpush3.bf16.msra.mxu0 %v2741_v30  ;;  %v3384_v30 = vld [vmem:[%s3756_s1 + $0x50] sm:$0xff] }
  0x1f   : > { %2328 = vmatprep.mubr.msk.f32.mxu1 %vm281_vm0, %v202_v16  ;;  %2746 = vmatprep.subr.bf16.mxu0 %v2745_v34 }
  0x22   : > { %2329 = vmatmul.mubr.msk.f32.gmra.mrb[4].mxu1 %vm281_vm0, %v203_v17 }
  0x23   : > { %2331 = vmatprep.mubr.msk.f32.mxu1 %vm281_vm0, %v204_v18 }
  0x26   : > { %2332 = vmatmul.mubr.msk.f32.gmra.mrb[6].mxu1 %vm281_vm0, %v205_v19 }
  0x27   : > { %2334 = vmatprep.mubr.msk.f32.mxu1 %vm281_vm0, %v206_v20 }
  0x2a   : > { %2335 = vmatmul.mubr.msk.f32.gmra.mrb[8].mxu1 %vm281_vm0, %v207_v21  ;;  %v3334_v21 = vld [vmem:[%s3756_s1 + $0x8] sm:$0xff] }
  0x2b   : > { %2337 = vmatprep.mubr.msk.f32.mxu1 %vm281_vm0, %v208_v22  ;;  %v3339_v22 = vld [vmem:[%s3756_s1 + $0x10] sm:$0xff] }
  0x2e   : > { %2338 = vmatmul.mubr.msk.f32.gmra.mrb[10].mxu1 %vm281_vm0, %v209_v23  ;;  %v3346_v23 = vld [vmem:[%s3756_s1 + $0x18] sm:$0xff] }
  0x2f   : > { %2340 = vmatprep.mubr.msk.f32.mxu1 %vm281_vm0, %v210_v24  ;;  %v3351_v24 = vld [vmem:[%s3756_s1 + $0x20] sm:$0xff] }
  0x32   : > { %2341 = vmatmul.mubr.msk.f32.gmra.mrb[12].mxu1 %vm281_vm0, %v211_v25  ;;  %v3358_v25 = vld [vmem:[%s3756_s1 + $0x28] sm:$0xff] }
  0x33   : > { %2343 = vmatprep.mubr.msk.f32.mxu1 %vm281_vm0, %v212_v26  ;;  %v3363_v26 = vld [vmem:[%s3756_s1 + $0x30] sm:$0xff] }
  0x36   : > { %2344 = vmatmul.mubr.msk.f32.gmra.mrb[14].mxu1 %vm281_vm0, %v213_v27  ;;  %v3370_v27 = vld [vmem:[%s3756_s1 + $0x38] sm:$0xff] }
  0x37   : > { %2378 = vmatprep.mubr.f32.mxu1 %v3267_v31 }
  0xed   : > { %v2324_v36 = vpop.f32.mrb[0].mxu1 }
  0xee   : > { %v402_v39 = vadd.f32 %v2324_v36, %v3279_v35  ;;  %v396_v40 = vpop.f32.mrb[1].mxu1  ;;  %v3415_v36 = vld [vmem:[%s3756_s1 + $0x78] sm:$0xff] }
  0xef   : > { %v397_v41 = vadd.f32 %v3279_v35, %v396_v40 }
  0xf1   : > { %v2697_v43 = vpack.c.bf16 %v402_v39, %v397_v41  ;;  %v2327_v44 = vpop.f32.mrb[2].mxu1  ;;  %2418 = vmatprep.mubr.msk.f32.mxu0 %vm620_vm1, %v397_v41 }
  0xf2   : > { %v412_v47 = vadd.f32 %v2327_v44, %v3279_v35  ;;  %v406_v48 = vpop.f32.mrb[3].mxu1  ;;  %2419 = vmatmul.mubr.msk.f32.vlgmr.msra.gmra.mrb[0].mxu0 %vm620_vm1, %v402_v39 }
  0xf3   : > { %v407_v49 = vadd.f32 %v3279_v35, %v406_v48  ;;  %2698 = vmatprep.subr.bf16.mxu1 %v2697_v43  ;;  %2748 = vmatpush3.bf16.msra.mxu0 %v2745_v34  ;;  %v3403_v34 = vld [vmem:[%s3756_s1 + $0x68] sm:$0xff] }
  0xf4   : > { %2700 = vmatpush3.bf16.msra.mxu1 %v2697_v43  ;;  %2750 = vmatprep.subr.bf16.mxu0 %v2749_v42 }
  0xf5   : > { %v2701_v51 = vpack.c.bf16 %v412_v47, %v407_v49  ;;  %v2330_v52 = vpop.f32.mrb[4].mxu1  ;;  %2421 = vmatprep.mubr.msk.f32.mxu0 %vm620_vm1, %v407_v49 }
  0xf6   : > { %v422_v55 = vadd.f32 %v2330_v52, %v3279_v35  ;;  %v416_v56 = vpop.f32.mrb[5].mxu1  ;;  %2422 = vmatmul.mubr.msk.f32.gmra.mrb[2].mxu0 %vm620_vm1, %v412_v47 }
  0xf7   : > { %v417_v57 = vadd.f32 %v3279_v35, %v416_v56  ;;  %2702 = vmatprep.subr.bf16.mxu1 %v2701_v51  ;;  %2752 = vmatpush3.bf16.msra.mxu0 %v2749_v42 }
  0xf8   : > { %2704 = vmatpush3.bf16.msra.mxu1 %v2701_v51  ;;  %2754 = vmatprep.subr.bf16.mxu0 %v2753_v50 }
  0xf9   : > { %v2705_v59 = vpack.c.bf16 %v422_v55, %v417_v57  ;;  %v2333_v60 = vpop.f32.mrb[6].mxu1  ;;  %2424 = vmatprep.mubr.msk.f32.mxu0 %vm620_vm1, %v417_v57 }
  0xfa   : > { %v432_v61 = vadd.f32 %v2333_v60, %v3279_v35  ;;  %v426_v62 = vpop.f32.mrb[7].mxu1  ;;  %2425 = vmatmul.mubr.msk.f32.gmra.mrb[4].mxu0 %vm620_vm1, %v422_v55 }
  0xfb   : > { %v427_v63 = vadd.f32 %v3279_v35, %v426_v62  ;;  %2706 = vmatprep.subr.bf16.mxu1 %v2705_v59  ;;  %2756 = vmatpush3.bf16.msra.mxu0 %v2753_v50 }
  0xfc   : > { %2708 = vmatpush3.bf16.msra.mxu1 %v2705_v59  ;;  %2758 = vmatprep.subr.bf16.mxu0 %v2757_v58 }
  0xfd   : > { %v2709_v0 = vpack.c.bf16 %v432_v61, %v427_v63  ;;  %v2336_v1 = vpop.f32.mrb[8].mxu1  ;;  %2427 = vmatprep.mubr.msk.f32.mxu0 %vm620_vm1, %v427_v63 }
  0xfe   : > { %v442_v2 = vadd.f32 %v2336_v1, %v3279_v35  ;;  %v436_v3 = vpop.f32.mrb[9].mxu1  ;;  %2428 = vmatmul.mubr.msk.f32.gmra.mrb[6].mxu0 %vm620_vm1, %v432_v61 }
  0xff   : > { %v437_v4 = vadd.f32 %v3279_v35, %v436_v3  ;;  %2710 = vmatprep.subr.bf16.mxu1 %v2709_v0  ;;  %2760 = vmatpush3.bf16.msra.mxu0 %v2757_v58 }
 0x100   : > { %2712 = vmatpush3.bf16.msra.mxu1 %v2709_v0 }
 0x101   : > { %v2713_v5 = vpack.c.bf16 %v442_v2, %v437_v4  ;;  %v2339_v6 = vpop.f32.mrb[10].mxu1  ;;  %2430 = vmatprep.mubr.msk.f32.mxu0 %vm620_vm1, %v437_v4 }
 0x102   : > { %v452_v7 = vadd.f32 %v2339_v6, %v3279_v35  ;;  %v446_v8 = vpop.f32.mrb[11].mxu1  ;;  %2431 = vmatmul.mubr.msk.f32.gmra.mrb[8].mxu0 %vm620_vm1, %v442_v2 }
 0x103   : > { %v447_v9 = vadd.f32 %v3279_v35, %v446_v8  ;;  %2714 = vmatprep.subr.bf16.mxu1 %v2713_v5 }
 0x104   : > { %2716 = vmatpush3.bf16.msra.mxu1 %v2713_v5 }
 0x105   : > { %v2717_v10 = vpack.c.bf16 %v452_v7, %v447_v9  ;;  %v2342_v11 = vpop.f32.mrb[12].mxu1  ;;  %2433 = vmatprep.mubr.msk.f32.mxu0 %vm620_vm1, %v447_v9 }
 0x106   : > { %v462_v12 = vadd.f32 %v2342_v11, %v3279_v35  ;;  %v456_v13 = vpop.f32.mrb[13].mxu1  ;;  %2434 = vmatmul.mubr.msk.f32.gmra.mrb[10].mxu0 %vm620_vm1, %v452_v7 }
 0x107   : > { %v457_v14 = vadd.f32 %v3279_v35, %v456_v13  ;;  %2718 = vmatprep.subr.bf16.mxu1 %v2717_v10 }
 0x108   : > { %2720 = vmatpush3.bf16.msra.mxu1 %v2717_v10 }
 0x109   : > { %v2721_v15 = vpack.c.bf16 %v462_v12, %v457_v14  ;;  %v2345_v16 = vpop.f32.mrb[14].mxu1  ;;  %2436 = vmatprep.mubr.msk.f32.mxu0 %vm620_vm1, %v457_v14 }
 0x10a   : > { %v472_v17 = vadd.f32 %v2345_v16, %v3279_v35  ;;  %v466_v18 = vpop.f32.mrb[15].mxu1  ;;  %2437 = vmatmul.mubr.msk.f32.gmra.mrb[12].mxu0 %vm620_vm1, %v462_v12 }
 0x10b   : > { %v467_v19 = vadd.f32 %v3279_v35, %v466_v18  ;;  %2722 = vmatprep.subr.bf16.mxu1 %v2721_v15  ;;  %v3408_v35 = vld [vmem:[%s3756_s1 + $0x70] sm:$0xff] }
 0x10c   : > { %2724 = vmatpush3.bf16.msra.mxu1 %v2721_v15 }
 0x10d   : > { %v2725_v20 = vpack.c.bf16 %v472_v17, %v467_v19  ;;  %2439 = vmatprep.mubr.msk.f32.mxu0 %vm620_vm1, %v467_v19 }
 0x10e   : > { %2440 = vmatmul.mubr.msk.f32.gmra.mrb[14].mxu0 %vm620_vm1, %v472_v17 }
 0x10f   : > { %2726 = vmatprep.subr.bf16.mxu1 %v2725_v20 }
 0x110   : > { %2728 = vmatpush3.bf16.msra.mxu1 %v2725_v20 }
 0x113   : > { %2379 = vmatmul.mubr.f32.vlgmr.msra.gmra.mrb[16].mxu1 %v3334_v21 }
 0x114   : > { %2381 = vmatprep.mubr.f32.mxu1 %v3339_v22 }
 0x117   : > { %2382 = vmatmul.mubr.f32.gmra.mrb[18].mxu1 %v3346_v23 }
 0x118   : > { %2384 = vmatprep.mubr.f32.mxu1 %v3351_v24 }
 0x11b   : > { %2385 = vmatmul.mubr.f32.gmra.mrb[20].mxu1 %v3358_v25 }
 0x11c   : > { %2387 = vmatprep.mubr.f32.mxu1 %v3363_v26 }
 0x11f   : > { %2388 = vmatmul.mubr.f32.gmra.mrb[22].mxu1 %v3370_v27 }
 0x120   : > { %2390 = vmatprep.mubr.f32.mxu1 %v222_v28 }
 0x123   : > { %2391 = vmatmul.mubr.f32.gmra.mrb[24].mxu1 %v3379_v29 }
 0x124   : > { %2393 = vmatprep.mubr.f32.mxu1 %v3384_v30 }
 0x127   : > { %2394 = vmatmul.mubr.f32.gmra.mrb[26].mxu1 %v3391_v32 }
 0x128   : > { %2396 = vmatprep.mubr.f32.mxu1 %v3396_v33 }
 0x12b   : > { %2397 = vmatmul.mubr.f32.gmra.mrb[28].mxu1 %v3403_v34 }
 0x12c   : > { %2399 = vmatprep.mubr.f32.mxu1 %v3408_v35 }
 0x12f   : > { %2400 = vmatmul.mubr.f32.gmra.mrb[30].mxu1 %v3415_v36 }
 0x130   : > { %2526 = vmatprep.mubr.f32.mxu1 %v222_v28 }
 0x1e6   : > { %v2380_v37 = vpop.f32.mrb[16].mxu1 }
 0x1e7   : > { %v541_v38 = vpop.f32.mrb[17].mxu1 }
 0x1e8   : > { %2458 = vmatprep.mubr.msk.f32.mxu0 %vm620_vm1, %v541_v38 }
 0x1e9   : > { %2459 = vmatmul.mubr.msk.f32.vlgmr.msra.gmra.mrb[0].mxu0 %vm620_vm1, %v2380_v37 }
 0x1ea   : > { %v2383_v39 = vpop.f32.mrb[18].mxu1 }
 0x1eb   : > { %v551_v40 = vpop.f32.mrb[19].mxu1 }
 0x1ec   : > { %2461 = vmatprep.mubr.msk.f32.mxu0 %vm620_vm1, %v551_v40 }
 0x1ed   : > { %2462 = vmatmul.mubr.msk.f32.gmra.mrb[2].mxu0 %vm620_vm1, %v2383_v39 }
 0x1ee   : > { %v2386_v41 = vpop.f32.mrb[20].mxu1 }
 0x1ef   : > { %v561_v42 = vpop.f32.mrb[21].mxu1 }
 0x1f0   : > { %2464 = vmatprep.mubr.msk.f32.mxu0 %vm620_vm1, %v561_v42 }
 0x1f1   : > { %2465 = vmatmul.mubr.msk.f32.gmra.mrb[4].mxu0 %vm620_vm1, %v2386_v41 }
 0x1f2   : > { %v2389_v43 = vpop.f32.mrb[22].mxu1 }
 0x1f3   : > { %v571_v44 = vpop.f32.mrb[23].mxu1 }
 0x1f4   : > { %2467 = vmatprep.mubr.msk.f32.mxu0 %vm620_vm1, %v571_v44 }
 0x1f5   : > { %2468 = vmatmul.mubr.msk.f32.gmra.mrb[6].mxu0 %vm620_vm1, %v2389_v43 }
 0x1f6   : > { %v2392_v45 = vpop.f32.mrb[24].mxu1 }
 0x1f7   : > { %v581_v46 = vpop.f32.mrb[25].mxu1 }
 0x1f8   : > { %2470 = vmatprep.mubr.msk.f32.mxu0 %vm620_vm1, %v581_v46 }
 0x1f9   : > { %2471 = vmatmul.mubr.msk.f32.gmra.mrb[8].mxu0 %vm620_vm1, %v2392_v45 }
 0x1fa   : > { %v2395_v47 = vpop.f32.mrb[26].mxu1 }
 0x1fb   : > { %v591_v48 = vpop.f32.mrb[27].mxu1 }
 0x1fc   : > { %2473 = vmatprep.mubr.msk.f32.mxu0 %vm620_vm1, %v591_v48 }
 0x1fd   : > { %2474 = vmatmul.mubr.msk.f32.gmra.mrb[10].mxu0 %vm620_vm1, %v2395_v47 }
 0x1fe   : > { %v2398_v49 = vpop.f32.mrb[28].mxu1 }
 0x1ff   : > { %v601_v50 = vpop.f32.mrb[29].mxu1 }
 0x200   : > { %2476 = vmatprep.mubr.msk.f32.mxu0 %vm620_vm1, %v601_v50 }
 0x201   : > { %2477 = vmatmul.mubr.msk.f32.gmra.mrb[12].mxu0 %vm620_vm1, %v2398_v49 }
 0x202   : > { %v2401_v51 = vpop.f32.mrb[30].mxu1 }
 0x203   : > { %v611_v52 = vpop.f32.mrb[31].mxu1 }
 0x204   : > { %2479 = vmatprep.mubr.msk.f32.mxu0 %vm620_vm1, %v611_v52 }
 0x205   : > { %2480 = vmatmul.mubr.msk.f32.gmra.mrb[14].mxu0 %vm620_vm1, %v2401_v51 }
 0x206   : > { %2514 = vmatprep.mubr.f32.mxu0 %v3267_v31 }
 0x2bc   : > { %v2460_v54 = vpop.f32.mrb[0].mxu0 }
 0x2bd   : > { %v1012_v55 = vadd.f32 %v2460_v54, %v3438_v53  ;;  %v928_v56 = vpop.f32.mrb[1].mxu0 }
 0x2be   : > { %v1011_v57 = vadd.f32 %v3438_v53, %v928_v56 }
 0x2bf   : > { %2955 = vtanh.f32 %v1012_v55 }
 0x2c0   : > { %2957 = vtanh.f32 %v1011_v57  ;;  %v2463_v58 = vpop.f32.mrb[2].mxu0  ;;  %v257_v57 = vld [vmem:[%s3757_s2 + $0xd0] sm:$0xff] }
 0x2c1   : > { %v1014_v59 = vadd.f32 %v2463_v58, %v3438_v53  ;;  %v938_v60 = vpop.f32.mrb[3].mxu0  ;;  %v258_v58 = vld [vmem:[%s3757_s2 + $0xd8] sm:$0xff] }
 0x2c2   : > { %v1013_v61 = vadd.f32 %v3438_v53, %v938_v60 }
 0x2c3   : > { %2959 = vtanh.f32 %v1014_v59 }
 0x2c4   : > { %2961 = vtanh.f32 %v1013_v61  ;;  %v2466_v31 = vpop.f32.mrb[4].mxu0 }
 0x2c5   : > { %v1016_v62 = vadd.f32 %v2466_v31, %v3438_v53  ;;  %v948_v63 = vpop.f32.mrb[5].mxu0  ;;  %v2793_v31 = vpack.c.bf16 %v258_v58, %v257_v57 }
 0x2c6   : > { %v1015_v0 = vadd.f32 %v3438_v53, %v948_v63  ;;  %v260_v63 = vld [vmem:[%s3757_s2 + $0xe8] sm:$0xff] }
 0x2c7   : > { %2963 = vtanh.f32 %v1016_v62  ;;  %v259_v62 = vld [vmem:[%s3757_s2 + $0xe0] sm:$0xff] }
 0x2c8   : > { %2965 = vtanh.f32 %v1015_v0  ;;  %v2469_v1 = vpop.f32.mrb[6].mxu0  ;;  %v2797_v0 = vpack.c.bf16 %v260_v63, %v259_v62 }
 0x2c9   : > { %v3446_v2 = vpop.eup %2955  ;;  %v1018_v3 = vadd.f32 %v2469_v1, %v3438_v53  ;;  %v958_v4 = vpop.f32.mrb[7].mxu0  ;;  %v261_v1 = vld [vmem:[%s3757_s2 + $0xf0] sm:$0xff] }
 0x2ca   : > { %v3449_v5 = vpop.eup %2957  ;;  %v1017_v6 = vadd.f32 %v3438_v53, %v958_v4 }
 0x2cb   : > { %2967 = vtanh.f32 %v1018_v3  ;;  %v2761_v7 = vpack.c.bf16 %v3446_v2, %v3449_v5  ;;  %v262_v3 = vld [vmem:[%s3757_s2 + $0xf8] sm:$0xff] }
 0x2cc   : > { %2969 = vtanh.f32 %v1017_v6  ;;  %v2472_v8 = vpop.f32.mrb[8].mxu0  ;;  %v2801_v4 = vpack.c.bf16 %v262_v3, %v261_v1  ;;  %v263_v6 = vld [vmem:[%s3757_s2 + $0x100] sm:$0xff] }
 0x2cd   : > { %v3454_v9 = vpop.eup %2959  ;;  %v1020_v10 = vadd.f32 %v2472_v8, %v3438_v53  ;;  %v968_v11 = vpop.f32.mrb[9].mxu0  ;;  %2762 = vmatprep.subr.bf16.mxu0 %v2761_v7  ;;  %2865 = vmatprep.subr.bf16.mxu1 %v2761_v7 }
 0x2ce   : > { %v3457_v12 = vpop.eup %2961  ;;  %v1019_v13 = vadd.f32 %v3438_v53, %v968_v11  ;;  %2764 = vmatpush3.bf16.msra.mxu0 %v2761_v7  ;;  %2873 = vmatpush3.bf16.msra.mxu1 %v2761_v7  ;;  %v264_v7 = vld [vmem:[%s3757_s2 + $0x108] sm:$0xff] }
 0x2cf   : > { %2971 = vtanh.f32 %v1020_v10  ;;  %v2765_v14 = vpack.c.bf16 %v3454_v9, %v3457_v12 }
 0x2d0   : > { %2973 = vtanh.f32 %v1019_v13  ;;  %v2475_v15 = vpop.f32.mrb[10].mxu0 }
 0x2d1   : > { %v3462_v16 = vpop.eup %2963  ;;  %v1022_v17 = vadd.f32 %v2475_v15, %v3438_v53  ;;  %v978_v18 = vpop.f32.mrb[11].mxu0  ;;  %2766 = vmatprep.subr.bf16.mxu0 %v2765_v14  ;;  %2866 = vmatprep.subr.bf16.mxu1 %v2765_v14 }
 0x2d2   : > { %v3465_v19 = vpop.eup %2965  ;;  %v1021_v20 = vadd.f32 %v3438_v53, %v978_v18  ;;  %2768 = vmatpush3.bf16.msra.mxu0 %v2765_v14  ;;  %2874 = vmatpush3.bf16.msra.mxu1 %v2765_v14 }
 0x2d3   : > { %2975 = vtanh.f32 %v1022_v17  ;;  %v2769_v28 = vpack.c.bf16 %v3462_v16, %v3465_v19 }
 0x2d4   : > { %2977 = vtanh.f32 %v1021_v20  ;;  %v2478_v37 = vpop.f32.mrb[12].mxu0 }
 0x2d5   : > { %v3470_v38 = vpop.eup %2967  ;;  %v1024_v39 = vadd.f32 %v2478_v37, %v3438_v53  ;;  %v988_v40 = vpop.f32.mrb[13].mxu0  ;;  %2770 = vmatprep.subr.bf16.mxu0 %v2769_v28  ;;  %2867 = vmatprep.subr.bf16.mxu1 %v2769_v28  ;;  %v266_v37 = vld [vmem:[%s3757_s2 + $0x118] sm:$0xff] }
 0x2d6   : > { %v3473_v41 = vpop.eup %2969  ;;  %v1023_v42 = vadd.f32 %v3438_v53, %v988_v40  ;;  %2772 = vmatpush3.bf16.msra.mxu0 %v2769_v28  ;;  %2875 = vmatpush3.bf16.msra.mxu1 %v2769_v28  ;;  %v265_v28 = vld [vmem:[%s3757_s2 + $0x110] sm:$0xff]  ;;  %v268_v40 = vld [vmem:[%s3757_s2 + $0x128] sm:$0xff] }
 0x2d7   : > { %2979 = vtanh.f32 %v1024_v39  ;;  %v2773_v43 = vpack.c.bf16 %v3470_v38, %v3473_v41  ;;  %v267_v39 = vld [vmem:[%s3757_s2 + $0x120] sm:$0xff] }
 0x2d8   : > { %2981 = vtanh.f32 %v1023_v42  ;;  %v2481_v44 = vpop.f32.mrb[14].mxu0  ;;  %v269_v42 = vld [vmem:[%s3757_s2 + $0x130] sm:$0xff] }
 0x2d9   : > { %v3478_v45 = vpop.eup %2971  ;;  %v1026_v46 = vadd.f32 %v2481_v44, %v3438_v53  ;;  %v998_v47 = vpop.f32.mrb[15].mxu0  ;;  %2774 = vmatprep.subr.bf16.mxu0 %v2773_v43  ;;  %2868 = vmatprep.subr.bf16.mxu1 %v2773_v43 }
 0x2da   : > { %v3481_v48 = vpop.eup %2973  ;;  %v1025_v49 = vadd.f32 %v3438_v53, %v998_v47  ;;  %2776 = vmatpush3.bf16.msra.mxu0 %v2773_v43  ;;  %2876 = vmatpush3.bf16.msra.mxu1 %v2773_v43  ;;  %v270_v43 = vld [vmem:[%s3757_s2 + $0x138] sm:$0xff] }
 0x2db   : > { %2983 = vtanh.f32 %v1026_v46  ;;  %v2777_v50 = vpack.c.bf16 %v3478_v45, %v3481_v48  ;;  %v2833_v44 = vpack.c.bf16 %v270_v43, %v269_v42  ;;  %v272_v46 = vld [vmem:[%s3757_s2 + $0x148] sm:$0xff] }
 0x2dc   : > { %2985 = vtanh.f32 %v1025_v49 }
 0x2dd   : > { %v3486_v51 = vpop.eup %2975  ;;  %2778 = vmatprep.subr.bf16.mxu0 %v2777_v50  ;;  %2869 = vmatprep.subr.bf16.mxu1 %v2777_v50 }
 0x2de   : > { %v3488_v52 = vpop.eup %2977  ;;  %2780 = vmatpush3.bf16.msra.mxu0 %v2777_v50  ;;  %2877 = vmatpush3.bf16.msra.mxu1 %v2777_v50 }
 0x2df   : > { %v2781_v54 = vpack.c.bf16 %v3486_v51, %v3488_v52 }
 0x2e1   : > { %v3492_v55 = vpop.eup %2979  ;;  %2782 = vmatprep.subr.bf16.mxu0 %v2781_v54  ;;  %2870 = vmatprep.subr.bf16.mxu1 %v2781_v54 }
 0x2e2   : > { %v3494_v53 = vpop.eup %2981  ;;  %2784 = vmatpush3.bf16.msra.mxu0 %v2781_v54  ;;  %2878 = vmatpush3.bf16.msra.mxu1 %v2781_v54 }
 0x2e3   : > { %v2785_v56 = vpack.c.bf16 %v3492_v55, %v3494_v53 }
 0x2e5   : > { %v3504_v59 = vpop.eup %2983  ;;  %2786 = vmatprep.subr.bf16.mxu0 %v2785_v56  ;;  %2871 = vmatprep.subr.bf16.mxu1 %v2785_v56 }
 0x2e6   : > { %v3506_v60 = vpop.eup %2985  ;;  %2788 = vmatpush3.bf16.msra.mxu0 %v2785_v56  ;;  %2879 = vmatpush3.bf16.msra.mxu1 %v2785_v56 }
 0x2e7   : > { %v2789_v61 = vpack.c.bf16 %v3504_v59, %v3506_v60 }
 0x2e9   : > { %2790 = vmatprep.subr.bf16.mxu0 %v2789_v61  ;;  %2872 = vmatprep.subr.bf16.mxu1 %v2789_v61 }
 0x2ea   : > { %2792 = vmatpush3.bf16.msra.mxu0 %v2789_v61  ;;  %2880 = vmatpush3.bf16.msra.mxu1 %v2789_v61 }
 0x2eb   : > { %2794 = vmatprep.subr.bf16.mxu1 %v2793_v31 }
 0x2ed   : > { %2515 = vmatmul.mubr.f32.vlgmr.msra.gmra.mrb[16].mxu0 %v3334_v21  ;;  %2527 = vmatmul.mubr.f32.vlgmr.msra.gmra.mrb[32].mxu1 %v3379_v29  ;;  %v2805_v21 = vpack.c.bf16 %v264_v7, %v263_v6  ;;  %v250_v29 = vld [vmem:[%s3757_s2 + $0x98] sm:$0xff] }
 0x2ee   : > { %2796 = vmatpush3.bf16.msra.mxu1 %v2793_v31  ;;  %2517 = vmatprep.mubr.f32.mxu0 %v3339_v22  ;;  %v249_v22 = vld [vmem:[%s3757_s2 + $0x90] sm:$0xff] }
 0x2ef   : > { %2529 = vmatprep.mubr.f32.mxu1 %v3384_v30  ;;  %2798 = vmatprep.subr.bf16.mxu1 %v2797_v0  ;;  %v252_v30 = vld [vmem:[%s3757_s2 + $0xa8] sm:$0xff] }
 0x2f1   : > { %2518 = vmatmul.mubr.f32.gmra.mrb[18].mxu0 %v3346_v23  ;;  %2530 = vmatmul.mubr.f32.gmra.mrb[34].mxu1 %v3391_v32  ;;  %v2809_v23 = vpack.c.bf16 %v250_v29, %v249_v22  ;;  %v254_v32 = vld [vmem:[%s3757_s2 + $0xb8] sm:$0xff] }
 0x2f2   : > { %2800 = vmatpush3.bf16.msra.mxu1 %v2797_v0  ;;  %2520 = vmatprep.mubr.f32.mxu0 %v3351_v24  ;;  %v251_v24 = vld [vmem:[%s3757_s2 + $0xa0] sm:$0xff] }
 0x2f3   : > { %2532 = vmatprep.mubr.f32.mxu1 %v3396_v33  ;;  %2802 = vmatprep.subr.bf16.mxu1 %v2801_v4  ;;  %v255_v33 = vld [vmem:[%s3757_s2 + $0xc0] sm:$0xff] }
 0x2f5   : > { %2521 = vmatmul.mubr.f32.gmra.mrb[20].mxu0 %v3358_v25  ;;  %2533 = vmatmul.mubr.f32.gmra.mrb[36].mxu1 %v3403_v34  ;;  %v2813_v25 = vpack.c.bf16 %v252_v30, %v251_v24  ;;  %v256_v34 = vld [vmem:[%s3757_s2 + $0xc8] sm:$0xff] }
 0x2f6   : > { %2804 = vmatpush3.bf16.msra.mxu1 %v2801_v4  ;;  %2523 = vmatprep.mubr.f32.mxu0 %v3363_v26  ;;  %v253_v26 = vld [vmem:[%s3757_s2 + $0xb0] sm:$0xff] }
 0x2f7   : > { %2535 = vmatprep.mubr.f32.mxu1 %v3408_v35  ;;  %2806 = vmatprep.subr.bf16.mxu1 %v2805_v21  ;;  %v2821_v35 = vpack.c.bf16 %v256_v34, %v255_v33 }
 0x2f9   : > { %2524 = vmatmul.mubr.f32.gmra.mrb[22].mxu0 %v3370_v27  ;;  %2536 = vmatmul.mubr.f32.gmra.mrb[38].mxu1 %v3415_v36  ;;  %v2817_v27 = vpack.c.bf16 %v254_v32, %v253_v26 }
 0x2fa   : > { %2808 = vmatpush3.bf16.msra.mxu1 %v2805_v21  ;;  %2554 = vmatprep.mubr.msk.f32.mxu1 %vm620_vm1, %v3449_v5 }
 0x2fb   : > { %2810 = vmatprep.subr.bf16.mxu1 %v2809_v23 }
 0x2fd   : > { %2555 = vmatmul.mubr.msk.f32.vlgmr.msra.gmra.mrb[40].mxu1 %vm620_vm1, %v3446_v2 }
 0x2fe   : > { %2557 = vmatprep.mubr.msk.f32.mxu1 %vm620_vm1, %v3457_v12  ;;  %2812 = vmatpush3.bf16.msra.mxu1 %v2809_v23 }
 0x2ff   : > { %2814 = vmatprep.subr.bf16.mxu1 %v2813_v25 }
 0x301   : > { %2558 = vmatmul.mubr.msk.f32.gmra.mrb[42].mxu1 %vm620_vm1, %v3454_v9 }
 0x302   : > { %2560 = vmatprep.mubr.msk.f32.mxu1 %vm620_vm1, %v3465_v19  ;;  %2816 = vmatpush3.bf16.msra.mxu1 %v2813_v25 }
 0x303   : > { %2818 = vmatprep.subr.bf16.mxu1 %v2817_v27 }
 0x305   : > { %2561 = vmatmul.mubr.msk.f32.gmra.mrb[44].mxu1 %vm620_vm1, %v3462_v16 }
 0x306   : > { %2563 = vmatprep.mubr.msk.f32.mxu1 %vm620_vm1, %v3473_v41  ;;  %2820 = vmatpush3.bf16.msra.mxu1 %v2817_v27  ;;  %v2829_v41 = vpack.c.bf16 %v268_v40, %v267_v39 }
 0x307   : > { %2822 = vmatprep.subr.bf16.mxu1 %v2821_v35 }
 0x309   : > { %2564 = vmatmul.mubr.msk.f32.gmra.mrb[46].mxu1 %vm620_vm1, %v3470_v38  ;;  %v2825_v38 = vpack.c.bf16 %v266_v37, %v265_v28 }
 0x30a   : > { %2566 = vmatprep.mubr.msk.f32.mxu1 %vm620_vm1, %v3481_v48  ;;  %2824 = vmatpush3.bf16.msra.mxu1 %v2821_v35  ;;  %v3641_v48 = vld [vmem:[%s3758_s3 + $0x2] ss:$0 sm:$0xff] }
 0x30b   : > { %2826 = vmatprep.subr.bf16.mxu0 %v2825_v38 }
 0x30c   : > { %2828 = vmatpush3.bf16.msra.mxu0 %v2825_v38 }
 0x30d   : > { %2567 = vmatmul.mubr.msk.f32.gmra.mrb[48].mxu1 %vm620_vm1, %v3478_v45  ;;  %2830 = vmatprep.subr.bf16.mxu0 %v2829_v41  ;;  %v271_v45 = vld [vmem:[%s3757_s2 + $0x140] sm:$0xff] }
 0x30e   : > { %2569 = vmatprep.mubr.msk.f32.mxu1 %vm620_vm1, %v3488_v52  ;;  %v2837_v47 = vpack.c.bf16 %v272_v46, %v271_v45 }
 0x310   : > { %2832 = vmatpush3.bf16.msra.mxu0 %v2829_v41 }
 0x311   : > { %2570 = vmatmul.mubr.msk.f32.gmra.mrb[50].mxu1 %vm620_vm1, %v3486_v51  ;;  %2834 = vmatprep.subr.bf16.mxu0 %v2833_v44 }
 0x312   : > { %2572 = vmatprep.mubr.msk.f32.mxu1 %vm620_vm1, %v3494_v53 }
 0x314   : > { %2836 = vmatpush3.bf16.msra.mxu0 %v2833_v44 }
 0x315   : > { %2573 = vmatmul.mubr.msk.f32.gmra.mrb[52].mxu1 %vm620_vm1, %v3492_v55  ;;  %2838 = vmatprep.subr.bf16.mxu0 %v2837_v47 }
 0x316   : > { %2575 = vmatprep.mubr.msk.f32.mxu1 %vm620_vm1, %v3506_v60 }
 0x318   : > { %2840 = vmatpush3.bf16.msra.mxu0 %v2837_v47 }
 0x319   : > { %2576 = vmatmul.mubr.msk.f32.gmra.mrb[54].mxu1 %vm620_vm1, %v3504_v59 }
 0x3c0   : > { %v2516_v36 = vpop.f32.mrb[16].mxu0  ;;  %v2528_v2 = vpop.f32.mrb[32].mxu1 }
 0x3c1   : > { %v1109_v5 = vpop.f32.mrb[17].mxu0  ;;  %v1149_v8 = vpop.f32.mrb[33].mxu1 }
 0x3c2   : > { %2594 = vmatprep.mubr.msk.f32.mxu1 %vm620_vm1, %v1109_v5 }
 0x3c3   : > { %2595 = vmatmul.mubr.msk.f32.vlgmr.msra.gmra.mrb[40].mxu1 %vm620_vm1, %v2516_v36 }
 0x3c4   : > { %v2519_v9 = vpop.f32.mrb[18].mxu0  ;;  %v2531_v10 = vpop.f32.mrb[34].mxu1 }
 0x3c5   : > { %v1119_v11 = vpop.f32.mrb[19].mxu0  ;;  %v1159_v12 = vpop.f32.mrb[35].mxu1 }
 0x3c6   : > { %2597 = vmatprep.mubr.msk.f32.mxu1 %vm620_vm1, %v1119_v11 }
 0x3c7   : > { %2598 = vmatmul.mubr.msk.f32.gmra.mrb[42].mxu1 %vm620_vm1, %v2519_v9 }
 0x3c8   : > { %v2522_v13 = vpop.f32.mrb[20].mxu0  ;;  %v2534_v14 = vpop.f32.mrb[36].mxu1 }
 0x3c9   : > { %v1129_v15 = vpop.f32.mrb[21].mxu0  ;;  %v1169_v16 = vpop.f32.mrb[37].mxu1 }
 0x3ca   : > { %2600 = vmatprep.mubr.msk.f32.mxu1 %vm620_vm1, %v1129_v15 }
 0x3cb   : > { %2601 = vmatmul.mubr.msk.f32.gmra.mrb[44].mxu1 %vm620_vm1, %v2522_v13 }
 0x3cc   : > { %v2525_v17 = vpop.f32.mrb[22].mxu0  ;;  %v2537_v18 = vpop.f32.mrb[38].mxu1 }
 0x3cd   : > { %v1139_v19 = vpop.f32.mrb[23].mxu0  ;;  %v1179_v20 = vpop.f32.mrb[39].mxu1 }
 0x3ce   : > { %2603 = vmatprep.mubr.msk.f32.mxu1 %vm620_vm1, %v1139_v19  ;;  %v3121_v19 = vmov 0.0  }
 0x3cf   : > { %2604 = vmatmul.mubr.msk.f32.gmra.mrb[46].mxu1 %vm620_vm1, %v2525_v17 }
 0x3d0   : > { %2606 = vmatprep.mubr.msk.f32.mxu1 %vm620_vm1, %v1149_v8 }
 0x3d3   : > { %2607 = vmatmul.mubr.msk.f32.gmra.mrb[48].mxu1 %vm620_vm1, %v2528_v2 }
 0x3d4   : > { %2609 = vmatprep.mubr.msk.f32.mxu1 %vm620_vm1, %v1159_v12 }
 0x3d7   : > { %2610 = vmatmul.mubr.msk.f32.gmra.mrb[50].mxu1 %vm620_vm1, %v2531_v10 }
 0x3d8   : > { %2612 = vmatprep.mubr.msk.f32.mxu1 %vm620_vm1, %v1169_v16 }
 0x3db   : > { %2613 = vmatmul.mubr.msk.f32.gmra.mrb[52].mxu1 %vm620_vm1, %v2534_v14 }
 0x3dc   : > { %2615 = vmatprep.mubr.msk.f32.mxu1 %vm620_vm1, %v1179_v20  ;;  %v3679_v20 = vld [vmem:[%s3758_s3 + $0x3] ss:$0 sm:$0xff] }
 0x3df   : > { %2616 = vmatmul.mubr.msk.f32.gmra.mrb[54].mxu1 %vm620_vm1, %v2537_v18  ;;  %v3119_v18 = vmov 0.0|0.0  }
 0x3e0   : > { %2841 = vmatprep.subr.bf16.mxu0 %v3119_v18 }
 0x496   : > { %v2596_v49 = vpop.f32.mrb[40].mxu1 }
 0x497   : > { %v1579_v50 = vadd.f32 %v2596_v49, %v3641_v48  ;;  %v1495_v51 = vpop.f32.mrb[41].mxu1 }
 0x498   : > { %v1578_v52 = vadd.f32 %v3641_v48, %v1495_v51 }
 0x49a   : > { %2987 = vtanh.f32 %v1578_v52  ;;  %v2599_v54 = vpop.f32.mrb[42].mxu1 }
 0x49b   : > { %2989 = vtanh.f32 %v1579_v50  ;;  %v1581_v55 = vadd.f32 %v2599_v54, %v3641_v48  ;;  %v1505_v53 = vpop.f32.mrb[43].mxu1 }
 0x49c   : > { %v1580_v56 = vadd.f32 %v3641_v48, %v1505_v53 }
 0x49e   : > { %2991 = vtanh.f32 %v1580_v56  ;;  %v2602_v57 = vpop.f32.mrb[44].mxu1 }
 0x49f   : > { %2993 = vtanh.f32 %v1581_v55  ;;  %v1583_v58 = vadd.f32 %v2602_v57, %v3641_v48  ;;  %v1515_v59 = vpop.f32.mrb[45].mxu1 }
 0x4a0   : > { %v1582_v60 = vadd.f32 %v3641_v48, %v1515_v59 }
 0x4a2   : > { %2995 = vtanh.f32 %v1582_v60  ;;  %v2605_v61 = vpop.f32.mrb[46].mxu1 }
 0x4a3   : > { %2997 = vtanh.f32 %v1583_v58  ;;  %v1585_v31 = vadd.f32 %v2605_v61, %v3641_v48  ;;  %v1525_v62 = vpop.f32.mrb[47].mxu1 }
 0x4a4   : > { %v2988_v63 = vpop.eup %2987  ;;  %v1584_v0 = vadd.f32 %v3641_v48, %v1525_v62 }
 0x4a5   : > { %v2990_v1 = vpop.eup %2989  ;;  %2634 = vmatprep.mubr.msk.f32.mxu0 %vm620_vm1, %v2988_v63 }
 0x4a6   : > { %2999 = vtanh.f32 %v1584_v0  ;;  %v2608_v3 = vpop.f32.mrb[48].mxu1  ;;  %2635 = vmatmul.mubr.msk.f32.vlgmr.msra.gmra.mrb[24].mxu0 %vm620_vm1, %v2990_v1 }
 0x4a7   : > { %3001 = vtanh.f32 %v1585_v31  ;;  %v1587_v4 = vadd.f32 %v2608_v3, %v3641_v48  ;;  %v1535_v6 = vpop.f32.mrb[49].mxu1 }
 0x4a8   : > { %v2992_v7 = vpop.eup %2991  ;;  %v1586_v21 = vadd.f32 %v3641_v48, %v1535_v6 }
 0x4a9   : > { %v2994_v22 = vpop.eup %2993  ;;  %2637 = vmatprep.mubr.msk.f32.mxu0 %vm620_vm1, %v2992_v7 }
 0x4aa   : > { %3003 = vtanh.f32 %v1586_v21  ;;  %v2611_v29 = vpop.f32.mrb[50].mxu1  ;;  %2638 = vmatmul.mubr.msk.f32.gmra.mrb[26].mxu0 %vm620_vm1, %v2994_v22 }
 0x4ab   : > { %3005 = vtanh.f32 %v1587_v4  ;;  %v1589_v23 = vadd.f32 %v2611_v29, %v3641_v48  ;;  %v1545_v24 = vpop.f32.mrb[51].mxu1 }
 0x4ac   : > { %v2996_v30 = vpop.eup %2995  ;;  %v1588_v25 = vadd.f32 %v3641_v48, %v1545_v24 }
 0x4ad   : > { %v2998_v26 = vpop.eup %2997  ;;  %2640 = vmatprep.mubr.msk.f32.mxu0 %vm620_vm1, %v2996_v30 }
 0x4ae   : > { %3007 = vtanh.f32 %v1588_v25  ;;  %v2614_v32 = vpop.f32.mrb[52].mxu1  ;;  %2641 = vmatmul.mubr.msk.f32.gmra.mrb[28].mxu0 %vm620_vm1, %v2998_v26 }
 0x4af   : > { %3009 = vtanh.f32 %v1589_v23  ;;  %v1591_v27 = vadd.f32 %v2614_v32, %v3641_v48  ;;  %v1555_v33 = vpop.f32.mrb[53].mxu1 }
 0x4b0   : > { %v3000_v34 = vpop.eup %2999  ;;  %v1590_v35 = vadd.f32 %v3641_v48, %v1555_v33 }
 0x4b1   : > { %v3002_v36 = vpop.eup %3001  ;;  %2643 = vmatprep.mubr.msk.f32.mxu0 %vm620_vm1, %v3000_v34 }
 0x4b2   : > { %3011 = vtanh.f32 %v1590_v35  ;;  %v2617_v2 = vpop.f32.mrb[54].mxu1  ;;  %2644 = vmatmul.mubr.msk.f32.gmra.mrb[30].mxu0 %vm620_vm1, %v3002_v36 }
 0x4b3   : > { %3013 = vtanh.f32 %v1591_v27  ;;  %v1593_v5 = vadd.f32 %v2617_v2, %v3641_v48  ;;  %v1565_v8 = vpop.f32.mrb[55].mxu1 }
 0x4b4   : > { %v3004_v9 = vpop.eup %3003  ;;  %v1592_v10 = vadd.f32 %v3641_v48, %v1565_v8 }
 0x4b5   : > { %v3006_v11 = vpop.eup %3005  ;;  %2646 = vmatprep.mubr.msk.f32.mxu0 %vm620_vm1, %v3004_v9 }
 0x4b6   : > { %3015 = vtanh.f32 %v1592_v10  ;;  %2647 = vmatmul.mubr.msk.f32.gmra.mrb[32].mxu0 %vm620_vm1, %v3006_v11 }
 0x4b7   : > { %3017 = vtanh.f32 %v1593_v5 }
 0x4b8   : > { %v3008_v12 = vpop.eup %3007 }
 0x4b9   : > { %v3010_v13 = vpop.eup %3009  ;;  %2649 = vmatprep.mubr.msk.f32.mxu0 %vm620_vm1, %v3008_v12 }
 0x4ba   : > { %2650 = vmatmul.mubr.msk.f32.gmra.mrb[34].mxu0 %vm620_vm1, %v3010_v13  ;;  %v230_v13 = vld [vmem:[%s3756_s1 + $0x80] sm:$0xff] }
 0x4bc   : > { %v3012_v14 = vpop.eup %3011 }
 0x4bd   : > { %v3014_v15 = vpop.eup %3013  ;;  %2652 = vmatprep.mubr.msk.f32.mxu0 %vm620_vm1, %v3012_v14 }
 0x4be   : > { %2653 = vmatmul.mubr.msk.f32.gmra.mrb[36].mxu0 %vm620_vm1, %v3014_v15 }
 0x4c0   : > { %v3016_v16 = vpop.eup %3015 }
 0x4c1   : > { %v3018_v17 = vpop.eup %3017  ;;  %2655 = vmatprep.mubr.msk.f32.mxu0 %vm620_vm1, %v3016_v16 }
 0x4c2   : > { %2656 = vmatmul.mubr.msk.f32.gmra.mrb[38].mxu0 %vm620_vm1, %v3018_v17 }
 0x4c3   : > { %2690 = vmatprep.mubr.msk.f32.mxu0 %vm3120_vm2, %v3121_v19 }
 0x579   : > { %v2636_v28 = vpop.f32.mrb[24].mxu0 }
 0x57a   : > { %v1734_v37 = vadd.f32 %v2636_v28, %v3679_v20  ;;  %v1728_v38 = vpop.f32.mrb[25].mxu0 }
 0x57b   : > { %v1729_v39 = vadd.f32 %v3679_v20, %v1728_v38  ;;  %v1893_v38 = vlaneseq }
 0x57c   : > { %3019 = vtanh.f32 %v1734_v37 }
 0x57d   : > { %3021 = vtanh.f32 %v1729_v39  ;;  %v2639_v40 = vpop.f32.mrb[26].mxu0 }
 0x57e   : > { %v1744_v41 = vadd.f32 %v2639_v40, %v3679_v20  ;;  %v1738_v42 = vpop.f32.mrb[27].mxu0 }
 0x57f   : > { %v1739_v43 = vadd.f32 %v3679_v20, %v1738_v42  ;;  %v1894_v42 = vand.u32 127, %v1893_v38 }
 0x580   : > { %3023 = vtanh.f32 %v1744_v41 }
 0x581   : > { %3025 = vtanh.f32 %v1739_v43  ;;  %v2642_v44 = vpop.f32.mrb[28].mxu0  ;;  %vm1912_vm4 = vcmp.ge.s32.totalorder %v1894_v42, 8 }
 0x582   : > { %v1754_v45 = vadd.f32 %v2642_v44, %v3679_v20  ;;  %v1748_v46 = vpop.f32.mrb[29].mxu0 }
 0x583   : > { %v1749_v47 = vadd.f32 %v3679_v20, %v1748_v46 }
 0x584   : > { %3027 = vtanh.f32 %v1754_v45 }
 0x585   : > { %3029 = vtanh.f32 %v1749_v47  ;;  %v2645_v48 = vpop.f32.mrb[30].mxu0 }
 0x586   : > { %v3020_v49 = vpop.eup %3019  ;;  %v1764_v50 = vadd.f32 %v2645_v48, %v3679_v20  ;;  %v1758_v51 = vpop.f32.mrb[31].mxu0 }
 0x587   : > { %v3022_v52 = vpop.eup %3021  ;;  %v1759_v54 = vadd.f32 %v3679_v20, %v1758_v51 }
 0x588   : > { %3031 = vtanh.f32 %v1764_v50  ;;  %v2842_v55 = vpack.c.bf16 %v3020_v49, %v3022_v52 }
 0x589   : > { %3033 = vtanh.f32 %v1759_v54  ;;  %v2648_v53 = vpop.f32.mrb[32].mxu0 }
 0x58a   : > { %v3024_v56 = vpop.eup %3023  ;;  %v1774_v57 = vadd.f32 %v2648_v53, %v3679_v20  ;;  %v1768_v58 = vpop.f32.mrb[33].mxu0  ;;  %2843 = vmatpush3.bf16.msra.mxu0 %v2842_v55 }
 0x58b   : > { %v3026_v59 = vpop.eup %3025  ;;  %v1769_v60 = vadd.f32 %v3679_v20, %v1768_v58  ;;  %2844 = vmatprep.subr.bf16.mxu0 %v3119_v18 }
 0x58c   : > { %3035 = vtanh.f32 %v1774_v57  ;;  %v2845_v61 = vpack.c.bf16 %v3024_v56, %v3026_v59 }
 0x58d   : > { %3037 = vtanh.f32 %v1769_v60  ;;  %v2651_v31 = vpop.f32.mrb[34].mxu0 }
 0x58e   : > { %v3028_v62 = vpop.eup %3027  ;;  %v1784_v63 = vadd.f32 %v2651_v31, %v3679_v20  ;;  %v1778_v0 = vpop.f32.mrb[35].mxu0  ;;  %2846 = vmatpush3.bf16.msra.mxu0 %v2845_v61 }
 0x58f   : > { %v3030_v1 = vpop.eup %3029  ;;  %v1779_v3 = vadd.f32 %v3679_v20, %v1778_v0  ;;  %2847 = vmatprep.subr.bf16.mxu0 %v3119_v18 }
 0x590   : > { %3039 = vtanh.f32 %v1784_v63  ;;  %v2848_v4 = vpack.c.bf16 %v3028_v62, %v3030_v1 }
 0x591   : > { %3041 = vtanh.f32 %v1779_v3  ;;  %v2654_v6 = vpop.f32.mrb[36].mxu0 }
 0x592   : > { %v3032_v7 = vpop.eup %3031  ;;  %v1794_v21 = vadd.f32 %v2654_v6, %v3679_v20  ;;  %v1788_v22 = vpop.f32.mrb[37].mxu0  ;;  %2849 = vmatpush3.bf16.msra.mxu0 %v2848_v4 }
 0x593   : > { %v3034_v29 = vpop.eup %3033  ;;  %v1789_v23 = vadd.f32 %v3679_v20, %v1788_v22  ;;  %2850 = vmatprep.subr.bf16.mxu0 %v3119_v18 }
 0x594   : > { %3043 = vtanh.f32 %v1794_v21  ;;  %v2851_v24 = vpack.c.bf16 %v3032_v7, %v3034_v29 }
 0x595   : > { %3045 = vtanh.f32 %v1789_v23  ;;  %v2657_v30 = vpop.f32.mrb[38].mxu0 }
 0x596   : > { %v3036_v25 = vpop.eup %3035  ;;  %v1804_v26 = vadd.f32 %v2657_v30, %v3679_v20  ;;  %v1798_v32 = vpop.f32.mrb[39].mxu0  ;;  %2852 = vmatpush3.bf16.msra.mxu0 %v2851_v24 }
 0x597   : > { %v3038_v27 = vpop.eup %3037  ;;  %v1799_v33 = vadd.f32 %v3679_v20, %v1798_v32  ;;  %2853 = vmatprep.subr.bf16.mxu0 %v3119_v18 }
 0x598   : > { %3047 = vtanh.f32 %v1804_v26  ;;  %v2854_v34 = vpack.c.bf16 %v3036_v25, %v3038_v27 }
 0x599   : > { %3049 = vtanh.f32 %v1799_v33 }
 0x59a   : > { %v3040_v35 = vpop.eup %3039  ;;  %2855 = vmatpush3.bf16.msra.mxu0 %v2854_v34 }
 0x59b   : > { %v3042_v36 = vpop.eup %3041  ;;  %2856 = vmatprep.subr.bf16.mxu0 %v3119_v18 }
 0x59c   : > { %v2857_v2 = vpack.c.bf16 %v3040_v35, %v3042_v36 }
 0x59e   : > { %v3044_v5 = vpop.eup %3043  ;;  %2858 = vmatpush3.bf16.msra.mxu0 %v2857_v2 }
 0x59f   : > { %v3046_v8 = vpop.eup %3045  ;;  %2859 = vmatprep.subr.bf16.mxu0 %v3119_v18 }
 0x5a0   : > { %v2860_v9 = vpack.c.bf16 %v3044_v5, %v3046_v8 }
 0x5a2   : > { %v3048_v10 = vpop.eup %3047  ;;  %2861 = vmatpush3.bf16.msra.mxu0 %v2860_v9 }
 0x5a3   : > { %v3050_v11 = vpop.eup %3049  ;;  %2862 = vmatprep.subr.bf16.mxu0 %v3119_v18 }
 0x5a4   : > { %v2863_v12 = vpack.c.bf16 %v3048_v10, %v3050_v11 }
 0x5a6   : > { %2864 = vmatpush3.bf16.msra.mxu0 %v2863_v12 }
 0x5a9   : > { %2691 = vmatmul.mubr.f32.vlgmr.msra.gmra.mrb[40].mxu0 %v230_v13 }
 0x67c   : > { %v1889_v14 = vpop.f32.mrb[40].mxu0 }
 0x67d   : > { %v1895_v15 = vadd.f32 0.54132485, %v1889_v14  ;;  %v2692_v16 = vpop.f32.mrb[41].mxu0 }
 0x67f   : > { %v1897_v17 = vand.u32 2147483647, %v1895_v15  ;;  %v1896_v45 = vmax.f32 %v1895_v15, 0.0 }
 0x681   : > { %v1898_v19 = vsub.f32 0.0, %v1897_v17 }
 0x683   : > { %v1899_v20 = vmul.f32 1.442695, %v1898_v19 }
 0x685   : > { %3051 = vpow2.f32 %v1899_v20 }
 0x68f   : > { %v3052_v28 = vpop.eup %3051 }
 0x690   : > { %v1901_v37 = vadd.f32 1.0, %v3052_v28  ;;  %v1904_v18 = vmul.f32 -0.5, %v3052_v28  ;;  %v1907_v40 = vand.u32 2147483647, %v3052_v28 }
 0x692   : > { %3053 = vlog2.f32 %v1901_v37  ;;  %v1905_v39 = vadd.f32 1.0, %v1904_v18  ;;  %vm1908_vm3 = vcmp.lt.f32.partialorder %v1907_v40, 0.0004427343 }
 0x694   : > { %v1906_v44 = vmul.f32 %v3052_v28, %v1905_v39 }
 0x69c   : > { %v3054_v41 = vpop.eup %3053 }
 0x69d   : > { %v1903_v43 = vmul.f32 0.6931472, %v3054_v41 }
 0x69f   : > { %v1909_v46 = vsel %vm1908_vm3, %v1906_v44, %v1903_v43 }
 0x6a0   : > { %v1910_v47 = vadd.f32 %v1909_v46, %v1896_v45 }
 0x6a2   : > { %v1911_v48 = vmax.f32 %v1910_v47, 0.0001 }
 0x6a4   : > { %v1913_v49 = vsel %vm1912_vm4, %v1911_v48, %v1889_v14 }
 0x6a5   : > { %1914 = vst.msk [vmem:[%s191_s22] sm:$0xff] %vm620_vm1, %v1913_v49 }
 0x6a6   : > { %3068 = shalt.err (!%p3065_p3)
}
 0x6a7   : > { %s3069_s8 = scalar_lea.hbm %s3712_s29, 128  ;;  %s3073_s11 = scalar_lea.hbm %s3759_s4, 256 }
 0x6a8   : > { %p3070_p4 = scmp.ne.s32.totalorder %s3712_s29, %s3069_s8  ;;  %p3074_p9 = scmp.lt.u32.totalorder %s3712_s29, %s3759_s4 }
 0x6a9   : > { %p3075_p10 = scmp.lt.u32.totalorder %s3073_s11, %s3069_s8  ;;  %p3077_p12 = scmp.lt.u32.totalorder %s3069_s8, %s3712_s29 }
 0x6aa   : > { %p3071_p7 = pnand %p3070_p4, %p3186_p5 }
 0x6ab   : > { %p3076_p11 = por %p3075_p10, %p3074_p9 }
 0x6ac   : > { %p3072_p8 = pneg %p3071_p7 }
 0x6ad   : > { %p3078_p13 = por %p3077_p12, %p3076_p11 }
 0x6af   : > { %p3079_p0 = pnand %p3078_p13, %p3072_p8 }
 0x6b1   : > { %3082 = shalt.err (!%p3079_p0)
}
 0x6b2   : > { %2913 = dma.vmem_to_hbm [thread:$0]  (%p3186_p5), %s3714_s23, 128, %s3712_s29, %s1916_s30  }
 0x6b3 PF: > { %p2919_p1 = scmp.ge.s32.totalorder %s3117_s18, 2  ;;  %s1941_s14 = sand.u32 1, %s3105_s15  }
 0x6b4   : > { %s1942_s20 = scalar_lea.sflag [#allocation3], %s1941_s14 }
 0x6b5   : > { %p2916_p2 = pnand %p2919_p1, %p3190_p6 }
 0x6b7   : > { %3100 = dma.done.wait (!%p2916_p2), %s1942_s20, 128  }
 0x6b8   : > { %3102 = vsyncadd (!%p2916_p2), %s1942_s20, 4294967168  ;;  %p14_p3 = scmp.ge.s32.totalorder %s3173_s21, 4   ;;  %s3762_s15 = smov %s3109_s16 }
 0x6b9   : > { %s3763_s16 = smov %s3113_s17  ;;  %s3764_s17 = smov %s3184_s24 }
 0x6ba   : > { %s3765_s18 = smov %s3173_s21  ;;  %16 = sbr.rel (!%p14_p3) target bundleno = 3 (0x3), region = 71 }
 0x6c1   :  { %1947 = vsyncpa [#allocation3], 1 }
 0x6c2   :  { %1949 = vsyncpa [#allocation3 + $0x1], 1 }

</bundles_post_ra>
